<compile_context>
chip_gen: v7x
topology: tpu7x:2x2x1
jax: 0.10.0
libtpu: 0.0.40
codegen_flags: <defaults>
</compile_context>

<pallas_src>
import functools

import jax
import jax.numpy as jnp
from jax import lax
from jax.experimental import pallas as pl
from jax.experimental.pallas import tpu as pltpu


# ----------------------------- kernel -----------------------------

def _leaky_relu(x, slope=0.1):
    return jnp.where(x > 0, x, slope * x)


def _ws_block_kernel(x_ref, wc_ref, sh_ref, *rest,
                     scales, use_out_conv, batch_block, matmul_dtype):
    if use_out_conv:
        wo_ref, sho_ref, out_ref = rest
    else:
        (out_ref,) = rest

    md = matmul_dtype
    cin = x_ref.shape[1]
    L = x_ref.shape[2]
    cs = cin // scales

    # ---- batch-invariant values, hoisted out of the per-batch loop ----
    # Edge masks for the k=3 / pad=1 conv: lane 0 has no "prev", lane L-1 no "next".
    lane_s = lax.broadcasted_iota(jnp.int32, (cs, L), 1)
    first_s = lane_s == 0
    last_s = lane_s == L - 1

    wc = wc_ref[...]                               # (S-1, Cs, 3*Cs), already md dtype
    sh = sh_ref[...]                               # (S-1, Cs, 1) f32 BN shifts
    if use_out_conv:
        wo = wo_ref[...]                           # (Cout, 3*Cin), md dtype
        sho = sho_ref[...]                         # (Cout, 1) f32
        lane_f = lax.broadcasted_iota(jnp.int32, (cin, L), 1)
        first_f = lane_f == 0
        last_f = lane_f == L - 1

    def shift3(z, first, last):
        """[z[:, l-1]; z[:, l]; z[:, l+1]] with zero padding, via XLU lane rolls."""
        zero = jnp.zeros_like(z)
        prev = jnp.where(first, zero, pltpu.roll(z, 1, axis=1))       # z[:, l-1]
        nxt = jnp.where(last, zero, pltpu.roll(z, L - 1, axis=1))     # z[:, l+1]
        return jnp.concatenate([prev, z, nxt], axis=0)                # (3*C, L)

    # Static (small) loop over the batch elements packed into this grid step.
    for b in range(batch_block):
        x = x_ref[b]                                                  # (Cin, L) f32
        ys = []
        for s in range(scales):
            xs = x[s * cs:(s + 1) * cs, :]                            # sublane-aligned slice
            if s == 0:
                y = xs                                                # passthrough chunk
            else:
                inp = xs if s == 1 else xs + ys[-1]
                x3 = shift3(inp, first_s, last_s).astype(md)          # (3*Cs, L)
                conv = jnp.dot(wc[s - 1], x3,
                               preferred_element_type=jnp.float32)
                y = _leaky_relu(conv + sh[s - 1])                     # shift is (Cs, 1)
            ys.append(y)

        # Sublane-axis concat of vreg-aligned (Cs, L) chunks (cheap in NCL layout);
        # feeds one wide-K output-conv dot instead of per-chunk accumulation.
        cat = jnp.concatenate(ys, axis=0)                             # (Cin, L)

        if use_out_conv:
            x3 = shift3(cat, first_f, last_f).astype(md)              # (3*Cin, L)
            conv = jnp.dot(wo, x3, preferred_element_type=jnp.float32)
            out_ref[b] = _leaky_relu(conv + sho).astype(out_ref.dtype)
        else:
            out_ref[b] = cat.astype(out_ref.dtype)                    # lane-dense store


# ----------------------------- wrapper -----------------------------

def width_scaled_block(x, params, scales=4, eps=1e-5, *, batch_block=None,
                       matmul_dtype=jnp.float32):
    """x: (N, Cin, L) float32 (PyTorch NCL).  Returns (N, Cout, L) float32.

    matmul_dtype: dtype used for the MXU operands (accumulation stays f32).
    Use jnp.bfloat16 on v6e/v7x for the fast MXU path.
    """
    N, Cin, L = x.shape
    assert Cin % scales == 0, "in_channel must be divisible by scales"
    Cs = Cin // scales
    assert L % 128 == 0, "L must be a multiple of 128 (lane width)"

    if batch_block is None:
        batch_block = next(bb for bb in (8, 4, 2, 1) if N % bb == 0)
    assert N % batch_block == 0

    md = jnp.dtype(matmul_dtype)

    def fuse_conv_bn(w, bias, bn):
        # w: (Co, Ci, 3) -> (Co, 3*Ci) with column order [k=0|k=1|k=2] blocks of Ci,
        # matching the shift3 row order [prev; curr; next].  Eval-mode BN scale is
        # folded into the weights; the remaining shift is returned as (Co, 1).
        gamma, beta, mean, var = bn
        scale = gamma / jnp.sqrt(var + eps)
        w_f = jnp.transpose(w, (0, 2, 1)).reshape(w.shape[0], 3 * w.shape[1])
        w_f = (w_f * scale[:, None]).astype(md)
        shift = ((bias - mean) * scale + beta).reshape(-1, 1).astype(jnp.float32)
        return w_f, shift

    wcs, shs = [], []
    for s in range(scales - 1):
        w_f, sh_f = fuse_conv_bn(params["wc"][s], params["bc"][s], params["bn"][s])
        wcs.append(w_f)
        shs.append(sh_f)
    wc = jnp.stack(wcs)                                     # (S-1, Cs, 3*Cs) md dtype
    sh = jnp.stack(shs)                                     # (S-1, Cs, 1) f32

    use_out_conv = params.get("wo") is not None
    if use_out_conv:
        Cout = params["wo"].shape[0]
        wo, sho = fuse_conv_bn(params["wo"], params["bo"], params["bno"])  # (Cout, 3*Cin), (Cout, 1)
    else:
        Cout = Cin

    x = x.astype(jnp.float32)

    in_specs = [
        pl.BlockSpec((batch_block, Cin, L), lambda n: (n, 0, 0)),
        pl.BlockSpec(wc.shape, lambda n: (0, 0, 0)),
        pl.BlockSpec(sh.shape, lambda n: (0, 0, 0)),
    ]
    args = [x, wc, sh]
    if use_out_conv:
        in_specs += [
            pl.BlockSpec(wo.shape, lambda n: (0, 0)),
            pl.BlockSpec(sho.shape, lambda n: (0, 0)),
        ]
        args += [wo, sho]

    # Advisory cost estimate so XLA schedules neighbours sensibly.
    flops = 2 * N * L * ((scales - 1) * Cs * 3 * Cs
                         + (3 * Cin * Cout if use_out_conv else 0))
    param_bytes = sum(int(a.size) * a.dtype.itemsize for a in args[1:])
    bytes_accessed = 4 * N * L * (Cin + Cout) + param_bytes
    cost = pl.CostEstimate(flops=int(flops), transcendentals=0,
                           bytes_accessed=int(bytes_accessed))

    # Generous VMEM limit with headroom (double-buffered in/out blocks + temps),
    # capped well below v7x's 64 MiB physical VMEM.
    block_bytes = 4 * batch_block * L * (Cin + Cout)
    vmem_limit = int(min(max(10 * block_bytes + (4 << 20), 16 << 20), 48 << 20))

    kernel = functools.partial(
        _ws_block_kernel, scales=scales, use_out_conv=use_out_conv,
        batch_block=batch_block, matmul_dtype=md)

    out = pl.pallas_call(
        kernel,
        out_shape=jax.ShapeDtypeStruct((N, Cout, L), jnp.float32),
        grid=(N // batch_block,),
        in_specs=in_specs,
        out_specs=pl.BlockSpec((batch_block, Cout, L), lambda n: (n, 0, 0)),
        compiler_params=pltpu.CompilerParams(
            dimension_semantics=("parallel",),
            vmem_limit_bytes=vmem_limit),
        cost_estimate=cost,
    )(*args)
    return out


# ----------------------------- params + pure-JAX reference -----------------------------

def init_params(key, in_channel, out_channel, scales=4):
    Cs = in_channel // scales
    keys = jax.random.split(key, scales)
    wc, bc, bn = [], [], []
    for s in range(scales - 1):
        k1, k2, k3, k4, k5, k6 = jax.random.split(keys[s], 6)
        wc.append(0.1 * jax.random.normal(k1, (Cs, Cs, 3), jnp.float32))    # (out, in, k)
        bc.append(0.1 * jax.random.normal(k2, (Cs,), jnp.float32))
        gamma = 1.0 + 0.1 * jax.random.normal(k3, (Cs,), jnp.float32)
        beta = 0.1 * jax.random.normal(k4, (Cs,), jnp.float32)
        mean = 0.1 * jax.random.normal(k5, (Cs,), jnp.float32)
        var = jax.random.uniform(k6, (Cs,), jnp.float32, minval=0.5, maxval=1.5)
        bn.append((gamma, beta, mean, var))
    p = {"wc": wc, "bc": bc, "bn": bn, "wo": None}
    if in_channel != out_channel:
        k1, k2, k3, k4, k5, k6 = jax.random.split(keys[-1], 6)
        p["wo"] = 0.1 * jax.random.normal(k1, (out_channel, in_channel, 3), jnp.float32)
        p["bo"] = 0.1 * jax.random.normal(k2, (out_channel,), jnp.float32)
        g = 1.0 + 0.1 * jax.random.normal(k3, (out_channel,), jnp.float32)
        b = 0.1 * jax.random.normal(k4, (out_channel,), jnp.float32)
        m = 0.1 * jax.random.normal(k5, (out_channel,), jnp.float32)
        v = jax.random.uniform(k6, (out_channel,), jnp.float32, minval=0.5, maxval=1.5)
        p["bno"] = (g, b, m, v)
    return p


def ref_forward(x, p, scales=4, eps=1e-5):
    """Pure-JAX reference matching the PyTorch forward (eval-mode BN)."""

    def conv1d(inp, w, b):  # inp (N,C,L), w (Co,Ci,3)
        out = lax.conv_general_dilated(
            inp, w, window_strides=(1,), padding=((1, 1),),
            dimension_numbers=("NCH", "OIH", "NCH"))
        return out + b[None, :, None]

    def bnorm(y, stats):
        g, b, m, v = stats
        return (y - m[None, :, None]) / jnp.sqrt(v[None, :, None] + eps) * g[None, :, None] + b[None, :, None]

    def lrelu(y):
        return jnp.where(y > 0, y, 0.1 * y)

    N, Cin, L = x.shape
    Cs = Cin // scales
    xs = [x[:, s * Cs:(s + 1) * Cs, :] for s in range(scales)]
    ys = [xs[0]]
    for s in range(1, scales):
        inp = xs[s] if s == 1 else xs[s] + ys[-1]
        ys.append(lrelu(bnorm(conv1d(inp, p["wc"][s - 1], p["bc"][s - 1]), p["bn"][s - 1])))
    out = jnp.concatenate(ys, axis=1)
    if p.get("wo") is not None:
        out = lrelu(bnorm(conv1d(out, p["wo"], p["bo"]), p["bno"]))
    return out


# ----------------------------- main -----------------------------

if __name__ == "__main__":
    key = jax.random.PRNGKey(0)
    kx, kp1, kp2 = jax.random.split(key, 3)

    N, Cin, Cout, L, scales = 2, 32, 64, 128, 4
    x = jax.random.normal(kx, (N, Cin, L), jnp.float32)

    # Case 1: in_channel != out_channel (uses the output conv block), f32 MXU.
    p1 = init_params(kp1, Cin, Cout, scales)
    out1 = jax.block_until_ready(width_scaled_block(x, p1, scales))
    ref1 = ref_forward(x, p1, scales)
    assert out1.shape == (N, Cout, L)
    assert jnp.allclose(out1, ref1, atol=1e-4, rtol=1e-4), "mismatch (out conv case)"

    # Case 2: in_channel == out_channel (no output conv block), f32 MXU.
    p2 = init_params(kp2, Cin, Cin, scales)
    out2 = jax.block_until_ready(width_scaled_block(x, p2, scales))
    ref2 = ref_forward(x, p2, scales)
    assert out2.shape == (N, Cin, L)
    assert jnp.allclose(out2, ref2, atol=1e-4, rtol=1e-4), "mismatch (identity case)"

    # Case 3: bf16 MXU operands (fast path on v6e/v7x), f32 accumulation.
    out3 = jax.block_until_ready(
        width_scaled_block(x, p1, scales, matmul_dtype=jnp.bfloat16))
    assert out3.shape == (N, Cout, L)
    assert jnp.allclose(out3, ref1, atol=7e-2, rtol=7e-2), "mismatch (bf16 case)"

    print("KERNEL_OK")
</pallas_src>

<mosaic_0001>
module attributes {stable_mosaic.version = 11 : i64} {
  func.func @_ws_block_kernel(%arg0: i32, %arg1: memref<2x32x128xf32, #tpu.memory_space<vmem>>, %arg2: memref<3x8x24xf32, #tpu.memory_space<vmem>>, %arg3: memref<3x8x1xf32, #tpu.memory_space<vmem>>, %arg4: memref<64x96xf32, #tpu.memory_space<vmem>>, %arg5: memref<64x1xf32, #tpu.memory_space<vmem>>, %arg6: memref<2x64x128xf32, #tpu.memory_space<vmem>>) attributes {dimension_semantics = [#tpu.dimension_semantics<parallel>], iteration_bounds = array<i64: 1>, scalar_prefetch = 0 : i64, scratch_operands = 0 : i64, tpu.core_type = #tpu.core_type<tc>, window_params = [{transform_indices = @transform_0, window_bounds = array<i64: 2, 32, 128>}, {pipeline_mode = #tpu.pipeline_mode<synchronous>, transform_indices = @transform_1, window_bounds = array<i64: 3, 8, 24>}, {pipeline_mode = #tpu.pipeline_mode<synchronous>, transform_indices = @transform_2, window_bounds = array<i64: 3, 8, 1>}, {pipeline_mode = #tpu.pipeline_mode<synchronous>, transform_indices = @transform_3, window_bounds = array<i64: 64, 96>}, {pipeline_mode = #tpu.pipeline_mode<synchronous>, transform_indices = @transform_4, window_bounds = array<i64: 64, 1>}, {transform_indices = @transform_5, window_bounds = array<i64: 2, 64, 128>}]} {
    %0 = tpu.iota {dimensions = array<i32: 1>} : vector<8x128xi32>
    %c0_i32 = arith.constant 0 : i32
    %1 = vector.broadcast %c0_i32 : i32 to vector<8x128xi32>
    %2 = arith.cmpi eq, %0, %1 : vector<8x128xi32>
    %c127_i32 = arith.constant 127 : i32
    %3 = vector.broadcast %c127_i32 : i32 to vector<8x128xi32>
    %4 = arith.cmpi eq, %0, %3 : vector<8x128xi32>
    %c0 = arith.constant 0 : index
    %c0_0 = arith.constant 0 : index
    %c0_1 = arith.constant 0 : index
    %5 = vector.load %arg2[%c0, %c0_0, %c0_1] : memref<3x8x24xf32, #tpu.memory_space<vmem>>, vector<3x8x24xf32>
    %c0_2 = arith.constant 0 : index
    %c0_3 = arith.constant 0 : index
    %c0_4 = arith.constant 0 : index
    %6 = vector.load %arg3[%c0_2, %c0_3, %c0_4] : memref<3x8x1xf32, #tpu.memory_space<vmem>>, vector<3x8x1xf32>
    %c0_5 = arith.constant 0 : index
    %c0_6 = arith.constant 0 : index
    %7 = vector.load %arg4[%c0_5, %c0_6] : memref<64x96xf32, #tpu.memory_space<vmem>>, vector<64x96xf32>
    %c0_7 = arith.constant 0 : index
    %c0_8 = arith.constant 0 : index
    %8 = vector.load %arg5[%c0_7, %c0_8] : memref<64x1xf32, #tpu.memory_space<vmem>>, vector<64x1xf32>
    %9 = tpu.iota {dimensions = array<i32: 1>} : vector<32x128xi32>
    %c0_i32_9 = arith.constant 0 : i32
    %10 = vector.broadcast %c0_i32_9 : i32 to vector<32x128xi32>
    %11 = arith.cmpi eq, %9, %10 : vector<32x128xi32>
    %c127_i32_10 = arith.constant 127 : i32
    %12 = vector.broadcast %c127_i32_10 : i32 to vector<32x128xi32>
    %13 = arith.cmpi eq, %9, %12 : vector<32x128xi32>
    %c0_11 = arith.constant 0 : index
    %c0_12 = arith.constant 0 : index
    %c0_13 = arith.constant 0 : index
    %14 = vector.load %arg1[%c0_11, %c0_12, %c0_13] : memref<2x32x128xf32, #tpu.memory_space<vmem>>, vector<1x32x128xf32>
    %15 = vector.shape_cast %14 : vector<1x32x128xf32> to vector<32x128xf32>
    %16 = vector.extract_strided_slice %15 {offsets = [0, 0], sizes = [8, 128], strides = [1, 1]} : vector<32x128xf32> to vector<8x128xf32>
    %17 = vector.extract_strided_slice %15 {offsets = [8, 0], sizes = [8, 128], strides = [1, 1]} : vector<32x128xf32> to vector<8x128xf32>
    %cst = arith.constant 0.000000e+00 : f32
    %18 = vector.broadcast %cst : f32 to vector<8x128xf32>
    %c1_i32 = arith.constant 1 : i32
    %19 = tpu.dynamic_rotate %17 by %c1_i32 dim 1 : vector<8x128xf32>, i32 -> vector<8x128xf32>
    %20 = arith.select %2, %18, %19 : vector<8x128xi1>, vector<8x128xf32>
    %c127_i32_14 = arith.constant 127 : i32
    %21 = tpu.dynamic_rotate %17 by %c127_i32_14 dim 1 : vector<8x128xf32>, i32 -> vector<8x128xf32>
    %22 = arith.select %4, %18, %21 : vector<8x128xi1>, vector<8x128xf32>
    %23 = tpu.concatenate %20, %17, %22 in 0 : vector<8x128xf32>, vector<8x128xf32>, vector<8x128xf32> -> vector<24x128xf32>
    %24 = vector.extract_strided_slice %5 {offsets = [0, 0, 0], sizes = [1, 8, 24], strides = [1, 1, 1]} : vector<3x8x24xf32> to vector<1x8x24xf32>
    %25 = vector.shape_cast %24 : vector<1x8x24xf32> to vector<8x24xf32>
    %cst_15 = arith.constant dense<0.000000e+00> : vector<8x128xf32>
    %26 = tpu.matmul %25, %23, %cst_15 {dimension_numbers = #tpu.dot_dimension_numbers<[1], [0], [0], [1], [0, 0, 1, 1], [], []>} : vector<8x24xf32>, vector<24x128xf32>, vector<8x128xf32> -> vector<8x128xf32>
    %27 = vector.extract_strided_slice %6 {offsets = [0, 0, 0], sizes = [1, 8, 1], strides = [1, 1, 1]} : vector<3x8x1xf32> to vector<1x8x1xf32>
    %28 = vector.shape_cast %27 : vector<1x8x1xf32> to vector<8x1xf32>
    %29 = vector.broadcast %28 : vector<8x1xf32> to vector<8x128xf32>
    %30 = arith.addf %26, %29 : vector<8x128xf32>
    %cst_16 = arith.constant 0.000000e+00 : f32
    %31 = vector.broadcast %cst_16 : f32 to vector<8x128xf32>
    %32 = arith.cmpf ogt, %30, %31 : vector<8x128xf32>
    %cst_17 = arith.constant 1.000000e-01 : f32
    %33 = vector.broadcast %cst_17 : f32 to vector<8x128xf32>
    %34 = arith.mulf %33, %30 : vector<8x128xf32>
    %35 = arith.select %32, %30, %34 : vector<8x128xi1>, vector<8x128xf32>
    %36 = vector.extract_strided_slice %15 {offsets = [16, 0], sizes = [8, 128], strides = [1, 1]} : vector<32x128xf32> to vector<8x128xf32>
    %37 = arith.addf %36, %35 : vector<8x128xf32>
    %cst_18 = arith.constant 0.000000e+00 : f32
    %38 = vector.broadcast %cst_18 : f32 to vector<8x128xf32>
    %c1_i32_19 = arith.constant 1 : i32
    %39 = tpu.dynamic_rotate %37 by %c1_i32_19 dim 1 : vector<8x128xf32>, i32 -> vector<8x128xf32>
    %40 = arith.select %2, %38, %39 : vector<8x128xi1>, vector<8x128xf32>
    %c127_i32_20 = arith.constant 127 : i32
    %41 = tpu.dynamic_rotate %37 by %c127_i32_20 dim 1 : vector<8x128xf32>, i32 -> vector<8x128xf32>
    %42 = arith.select %4, %38, %41 : vector<8x128xi1>, vector<8x128xf32>
    %43 = tpu.concatenate %40, %37, %42 in 0 : vector<8x128xf32>, vector<8x128xf32>, vector<8x128xf32> -> vector<24x128xf32>
    %44 = vector.extract_strided_slice %5 {offsets = [1, 0, 0], sizes = [1, 8, 24], strides = [1, 1, 1]} : vector<3x8x24xf32> to vector<1x8x24xf32>
    %45 = vector.shape_cast %44 : vector<1x8x24xf32> to vector<8x24xf32>
    %cst_21 = arith.constant dense<0.000000e+00> : vector<8x128xf32>
    %46 = tpu.matmul %45, %43, %cst_21 {dimension_numbers = #tpu.dot_dimension_numbers<[1], [0], [0], [1], [0, 0, 1, 1], [], []>} : vector<8x24xf32>, vector<24x128xf32>, vector<8x128xf32> -> vector<8x128xf32>
    %47 = vector.extract_strided_slice %6 {offsets = [1, 0, 0], sizes = [1, 8, 1], strides = [1, 1, 1]} : vector<3x8x1xf32> to vector<1x8x1xf32>
    %48 = vector.shape_cast %47 : vector<1x8x1xf32> to vector<8x1xf32>
    %49 = vector.broadcast %48 : vector<8x1xf32> to vector<8x128xf32>
    %50 = arith.addf %46, %49 : vector<8x128xf32>
    %cst_22 = arith.constant 0.000000e+00 : f32
    %51 = vector.broadcast %cst_22 : f32 to vector<8x128xf32>
    %52 = arith.cmpf ogt, %50, %51 : vector<8x128xf32>
    %cst_23 = arith.constant 1.000000e-01 : f32
    %53 = vector.broadcast %cst_23 : f32 to vector<8x128xf32>
    %54 = arith.mulf %53, %50 : vector<8x128xf32>
    %55 = arith.select %52, %50, %54 : vector<8x128xi1>, vector<8x128xf32>
    %56 = vector.extract_strided_slice %15 {offsets = [24, 0], sizes = [8, 128], strides = [1, 1]} : vector<32x128xf32> to vector<8x128xf32>
    %57 = arith.addf %56, %55 : vector<8x128xf32>
    %cst_24 = arith.constant 0.000000e+00 : f32
    %58 = vector.broadcast %cst_24 : f32 to vector<8x128xf32>
    %c1_i32_25 = arith.constant 1 : i32
    %59 = tpu.dynamic_rotate %57 by %c1_i32_25 dim 1 : vector<8x128xf32>, i32 -> vector<8x128xf32>
    %60 = arith.select %2, %58, %59 : vector<8x128xi1>, vector<8x128xf32>
    %c127_i32_26 = arith.constant 127 : i32
    %61 = tpu.dynamic_rotate %57 by %c127_i32_26 dim 1 : vector<8x128xf32>, i32 -> vector<8x128xf32>
    %62 = arith.select %4, %58, %61 : vector<8x128xi1>, vector<8x128xf32>
    %63 = tpu.concatenate %60, %57, %62 in 0 : vector<8x128xf32>, vector<8x128xf32>, vector<8x128xf32> -> vector<24x128xf32>
    %64 = vector.extract_strided_slice %5 {offsets = [2, 0, 0], sizes = [1, 8, 24], strides = [1, 1, 1]} : vector<3x8x24xf32> to vector<1x8x24xf32>
    %65 = vector.shape_cast %64 : vector<1x8x24xf32> to vector<8x24xf32>
    %cst_27 = arith.constant dense<0.000000e+00> : vector<8x128xf32>
    %66 = tpu.matmul %65, %63, %cst_27 {dimension_numbers = #tpu.dot_dimension_numbers<[1], [0], [0], [1], [0, 0, 1, 1], [], []>} : vector<8x24xf32>, vector<24x128xf32>, vector<8x128xf32> -> vector<8x128xf32>
    %67 = vector.extract_strided_slice %6 {offsets = [2, 0, 0], sizes = [1, 8, 1], strides = [1, 1, 1]} : vector<3x8x1xf32> to vector<1x8x1xf32>
    %68 = vector.shape_cast %67 : vector<1x8x1xf32> to vector<8x1xf32>
    %69 = vector.broadcast %68 : vector<8x1xf32> to vector<8x128xf32>
    %70 = arith.addf %66, %69 : vector<8x128xf32>
    %cst_28 = arith.constant 0.000000e+00 : f32
    %71 = vector.broadcast %cst_28 : f32 to vector<8x128xf32>
    %72 = arith.cmpf ogt, %70, %71 : vector<8x128xf32>
    %cst_29 = arith.constant 1.000000e-01 : f32
    %73 = vector.broadcast %cst_29 : f32 to vector<8x128xf32>
    %74 = arith.mulf %73, %70 : vector<8x128xf32>
    %75 = arith.select %72, %70, %74 : vector<8x128xi1>, vector<8x128xf32>
    %76 = tpu.concatenate %16, %35, %55, %75 in 0 : vector<8x128xf32>, vector<8x128xf32>, vector<8x128xf32>, vector<8x128xf32> -> vector<32x128xf32>
    %cst_30 = arith.constant 0.000000e+00 : f32
    %77 = vector.broadcast %cst_30 : f32 to vector<32x128xf32>
    %c1_i32_31 = arith.constant 1 : i32
    %78 = tpu.dynamic_rotate %76 by %c1_i32_31 dim 1 : vector<32x128xf32>, i32 -> vector<32x128xf32>
    %79 = arith.select %11, %77, %78 : vector<32x128xi1>, vector<32x128xf32>
    %c127_i32_32 = arith.constant 127 : i32
    %80 = tpu.dynamic_rotate %76 by %c127_i32_32 dim 1 : vector<32x128xf32>, i32 -> vector<32x128xf32>
    %81 = arith.select %13, %77, %80 : vector<32x128xi1>, vector<32x128xf32>
    %82 = tpu.concatenate %79, %76, %81 in 0 : vector<32x128xf32>, vector<32x128xf32>, vector<32x128xf32> -> vector<96x128xf32>
    %cst_33 = arith.constant dense<0.000000e+00> : vector<64x128xf32>
    %83 = tpu.matmul %7, %82, %cst_33 {dimension_numbers = #tpu.dot_dimension_numbers<[1], [0], [0], [1], [0, 0, 1, 1], [], []>} : vector<64x96xf32>, vector<96x128xf32>, vector<64x128xf32> -> vector<64x128xf32>
    %84 = vector.broadcast %8 : vector<64x1xf32> to vector<64x128xf32>
    %85 = arith.addf %83, %84 : vector<64x128xf32>
    %cst_34 = arith.constant 0.000000e+00 : f32
    %86 = vector.broadcast %cst_34 : f32 to vector<64x128xf32>
    %87 = arith.cmpf ogt, %85, %86 : vector<64x128xf32>
    %cst_35 = arith.constant 1.000000e-01 : f32
    %88 = vector.broadcast %cst_35 : f32 to vector<64x128xf32>
    %89 = arith.mulf %88, %85 : vector<64x128xf32>
    %90 = arith.select %87, %85, %89 : vector<64x128xi1>, vector<64x128xf32>
    %c0_36 = arith.constant 0 : index
    %c0_37 = arith.constant 0 : index
    %c0_38 = arith.constant 0 : index
    %91 = vector.load %arg6[%c0_36, %c0_37, %c0_38] : memref<2x64x128xf32, #tpu.memory_space<vmem>>, vector<1x64x128xf32>
    %92 = vector.shape_cast %91 : vector<1x64x128xf32> to vector<64x128xf32>
    %93 = vector.shape_cast %90 : vector<64x128xf32> to vector<1x64x128xf32>
    tpu.vector_store %arg6[%c0_36, %c0_37, %c0_38], %93 {strides = array<i32>} : memref<2x64x128xf32, #tpu.memory_space<vmem>>, vector<1x64x128xf32>,
    %c1 = arith.constant 1 : index
    %c0_39 = arith.constant 0 : index
    %c0_40 = arith.constant 0 : index
    %94 = vector.load %arg1[%c1, %c0_39, %c0_40] : memref<2x32x128xf32, #tpu.memory_space<vmem>>, vector<1x32x128xf32>
    %95 = vector.shape_cast %94 : vector<1x32x128xf32> to vector<32x128xf32>
    %96 = vector.extract_strided_slice %95 {offsets = [0, 0], sizes = [8, 128], strides = [1, 1]} : vector<32x128xf32> to vector<8x128xf32>
    %97 = vector.extract_strided_slice %95 {offsets = [8, 0], sizes = [8, 128], strides = [1, 1]} : vector<32x128xf32> to vector<8x128xf32>
    %cst_41 = arith.constant 0.000000e+00 : f32
    %98 = vector.broadcast %cst_41 : f32 to vector<8x128xf32>
    %c1_i32_42 = arith.constant 1 : i32
    %99 = tpu.dynamic_rotate %97 by %c1_i32_42 dim 1 : vector<8x128xf32>, i32 -> vector<8x128xf32>
    %100 = arith.select %2, %98, %99 : vector<8x128xi1>, vector<8x128xf32>
    %c127_i32_43 = arith.constant 127 : i32
    %101 = tpu.dynamic_rotate %97 by %c127_i32_43 dim 1 : vector<8x128xf32>, i32 -> vector<8x128xf32>
    %102 = arith.select %4, %98, %101 : vector<8x128xi1>, vector<8x128xf32>
    %103 = tpu.concatenate %100, %97, %102 in 0 : vector<8x128xf32>, vector<8x128xf32>, vector<8x128xf32> -> vector<24x128xf32>
    %104 = vector.extract_strided_slice %5 {offsets = [0, 0, 0], sizes = [1, 8, 24], strides = [1, 1, 1]} : vector<3x8x24xf32> to vector<1x8x24xf32>
    %105 = vector.shape_cast %104 : vector<1x8x24xf32> to vector<8x24xf32>
    %cst_44 = arith.constant dense<0.000000e+00> : vector<8x128xf32>
    %106 = tpu.matmul %105, %103, %cst_44 {dimension_numbers = #tpu.dot_dimension_numbers<[1], [0], [0], [1], [0, 0, 1, 1], [], []>} : vector<8x24xf32>, vector<24x128xf32>, vector<8x128xf32> -> vector<8x128xf32>
    %107 = vector.extract_strided_slice %6 {offsets = [0, 0, 0], sizes = [1, 8, 1], strides = [1, 1, 1]} : vector<3x8x1xf32> to vector<1x8x1xf32>
    %108 = vector.shape_cast %107 : vector<1x8x1xf32> to vector<8x1xf32>
    %109 = vector.broadcast %108 : vector<8x1xf32> to vector<8x128xf32>
    %110 = arith.addf %106, %109 : vector<8x128xf32>
    %cst_45 = arith.constant 0.000000e+00 : f32
    %111 = vector.broadcast %cst_45 : f32 to vector<8x128xf32>
    %112 = arith.cmpf ogt, %110, %111 : vector<8x128xf32>
    %cst_46 = arith.constant 1.000000e-01 : f32
    %113 = vector.broadcast %cst_46 : f32 to vector<8x128xf32>
    %114 = arith.mulf %113, %110 : vector<8x128xf32>
    %115 = arith.select %112, %110, %114 : vector<8x128xi1>, vector<8x128xf32>
    %116 = vector.extract_strided_slice %95 {offsets = [16, 0], sizes = [8, 128], strides = [1, 1]} : vector<32x128xf32> to vector<8x128xf32>
    %117 = arith.addf %116, %115 : vector<8x128xf32>
    %cst_47 = arith.constant 0.000000e+00 : f32
    %118 = vector.broadcast %cst_47 : f32 to vector<8x128xf32>
    %c1_i32_48 = arith.constant 1 : i32
    %119 = tpu.dynamic_rotate %117 by %c1_i32_48 dim 1 : vector<8x128xf32>, i32 -> vector<8x128xf32>
    %120 = arith.select %2, %118, %119 : vector<8x128xi1>, vector<8x128xf32>
    %c127_i32_49 = arith.constant 127 : i32
    %121 = tpu.dynamic_rotate %117 by %c127_i32_49 dim 1 : vector<8x128xf32>, i32 -> vector<8x128xf32>
    %122 = arith.select %4, %118, %121 : vector<8x128xi1>, vector<8x128xf32>
    %123 = tpu.concatenate %120, %117, %122 in 0 : vector<8x128xf32>, vector<8x128xf32>, vector<8x128xf32> -> vector<24x128xf32>
    %124 = vector.extract_strided_slice %5 {offsets = [1, 0, 0], sizes = [1, 8, 24], strides = [1, 1, 1]} : vector<3x8x24xf32> to vector<1x8x24xf32>
    %125 = vector.shape_cast %124 : vector<1x8x24xf32> to vector<8x24xf32>
    %cst_50 = arith.constant dense<0.000000e+00> : vector<8x128xf32>
    %126 = tpu.matmul %125, %123, %cst_50 {dimension_numbers = #tpu.dot_dimension_numbers<[1], [0], [0], [1], [0, 0, 1, 1], [], []>} : vector<8x24xf32>, vector<24x128xf32>, vector<8x128xf32> -> vector<8x128xf32>
    %127 = vector.extract_strided_slice %6 {offsets = [1, 0, 0], sizes = [1, 8, 1], strides = [1, 1, 1]} : vector<3x8x1xf32> to vector<1x8x1xf32>
    %128 = vector.shape_cast %127 : vector<1x8x1xf32> to vector<8x1xf32>
    %129 = vector.broadcast %128 : vector<8x1xf32> to vector<8x128xf32>
    %130 = arith.addf %126, %129 : vector<8x128xf32>
    %cst_51 = arith.constant 0.000000e+00 : f32
    %131 = vector.broadcast %cst_51 : f32 to vector<8x128xf32>
    %132 = arith.cmpf ogt, %130, %131 : vector<8x128xf32>
    %cst_52 = arith.constant 1.000000e-01 : f32
    %133 = vector.broadcast %cst_52 : f32 to vector<8x128xf32>
    %134 = arith.mulf %133, %130 : vector<8x128xf32>
    %135 = arith.select %132, %130, %134 : vector<8x128xi1>, vector<8x128xf32>
    %136 = vector.extract_strided_slice %95 {offsets = [24, 0], sizes = [8, 128], strides = [1, 1]} : vector<32x128xf32> to vector<8x128xf32>
    %137 = arith.addf %136, %135 : vector<8x128xf32>
    %cst_53 = arith.constant 0.000000e+00 : f32
    %138 = vector.broadcast %cst_53 : f32 to vector<8x128xf32>
    %c1_i32_54 = arith.constant 1 : i32
    %139 = tpu.dynamic_rotate %137 by %c1_i32_54 dim 1 : vector<8x128xf32>, i32 -> vector<8x128xf32>
    %140 = arith.select %2, %138, %139 : vector<8x128xi1>, vector<8x128xf32>
    %c127_i32_55 = arith.constant 127 : i32
    %141 = tpu.dynamic_rotate %137 by %c127_i32_55 dim 1 : vector<8x128xf32>, i32 -> vector<8x128xf32>
    %142 = arith.select %4, %138, %141 : vector<8x128xi1>, vector<8x128xf32>
    %143 = tpu.concatenate %140, %137, %142 in 0 : vector<8x128xf32>, vector<8x128xf32>, vector<8x128xf32> -> vector<24x128xf32>
    %144 = vector.extract_strided_slice %5 {offsets = [2, 0, 0], sizes = [1, 8, 24], strides = [1, 1, 1]} : vector<3x8x24xf32> to vector<1x8x24xf32>
    %145 = vector.shape_cast %144 : vector<1x8x24xf32> to vector<8x24xf32>
    %cst_56 = arith.constant dense<0.000000e+00> : vector<8x128xf32>
    %146 = tpu.matmul %145, %143, %cst_56 {dimension_numbers = #tpu.dot_dimension_numbers<[1], [0], [0], [1], [0, 0, 1, 1], [], []>} : vector<8x24xf32>, vector<24x128xf32>, vector<8x128xf32> -> vector<8x128xf32>
    %147 = vector.extract_strided_slice %6 {offsets = [2, 0, 0], sizes = [1, 8, 1], strides = [1, 1, 1]} : vector<3x8x1xf32> to vector<1x8x1xf32>
    %148 = vector.shape_cast %147 : vector<1x8x1xf32> to vector<8x1xf32>
    %149 = vector.broadcast %148 : vector<8x1xf32> to vector<8x128xf32>
    %150 = arith.addf %146, %149 : vector<8x128xf32>
    %cst_57 = arith.constant 0.000000e+00 : f32
    %151 = vector.broadcast %cst_57 : f32 to vector<8x128xf32>
    %152 = arith.cmpf ogt, %150, %151 : vector<8x128xf32>
    %cst_58 = arith.constant 1.000000e-01 : f32
    %153 = vector.broadcast %cst_58 : f32 to vector<8x128xf32>
    %154 = arith.mulf %153, %150 : vector<8x128xf32>
    %155 = arith.select %152, %150, %154 : vector<8x128xi1>, vector<8x128xf32>
    %156 = tpu.concatenate %96, %115, %135, %155 in 0 : vector<8x128xf32>, vector<8x128xf32>, vector<8x128xf32>, vector<8x128xf32> -> vector<32x128xf32>
    %cst_59 = arith.constant 0.000000e+00 : f32
    %157 = vector.broadcast %cst_59 : f32 to vector<32x128xf32>
    %c1_i32_60 = arith.constant 1 : i32
    %158 = tpu.dynamic_rotate %156 by %c1_i32_60 dim 1 : vector<32x128xf32>, i32 -> vector<32x128xf32>
    %159 = arith.select %11, %157, %158 : vector<32x128xi1>, vector<32x128xf32>
    %c127_i32_61 = arith.constant 127 : i32
    %160 = tpu.dynamic_rotate %156 by %c127_i32_61 dim 1 : vector<32x128xf32>, i32 -> vector<32x128xf32>
    %161 = arith.select %13, %157, %160 : vector<32x128xi1>, vector<32x128xf32>
    %162 = tpu.concatenate %159, %156, %161 in 0 : vector<32x128xf32>, vector<32x128xf32>, vector<32x128xf32> -> vector<96x128xf32>
    %cst_62 = arith.constant dense<0.000000e+00> : vector<64x128xf32>
    %163 = tpu.matmul %7, %162, %cst_62 {dimension_numbers = #tpu.dot_dimension_numbers<[1], [0], [0], [1], [0, 0, 1, 1], [], []>} : vector<64x96xf32>, vector<96x128xf32>, vector<64x128xf32> -> vector<64x128xf32>
    %164 = vector.broadcast %8 : vector<64x1xf32> to vector<64x128xf32>
    %165 = arith.addf %163, %164 : vector<64x128xf32>
    %cst_63 = arith.constant 0.000000e+00 : f32
    %166 = vector.broadcast %cst_63 : f32 to vector<64x128xf32>
    %167 = arith.cmpf ogt, %165, %166 : vector<64x128xf32>
    %cst_64 = arith.constant 1.000000e-01 : f32
    %168 = vector.broadcast %cst_64 : f32 to vector<64x128xf32>
    %169 = arith.mulf %168, %165 : vector<64x128xf32>
    %170 = arith.select %167, %165, %169 : vector<64x128xi1>, vector<64x128xf32>
    %c1_65 = arith.constant 1 : index
    %c0_66 = arith.constant 0 : index
    %c0_67 = arith.constant 0 : index
    %171 = vector.load %arg6[%c1_65, %c0_66, %c0_67] : memref<2x64x128xf32, #tpu.memory_space<vmem>>, vector<1x64x128xf32>
    %172 = vector.shape_cast %171 : vector<1x64x128xf32> to vector<64x128xf32>
    %173 = vector.shape_cast %170 : vector<64x128xf32> to vector<1x64x128xf32>
    tpu.vector_store %arg6[%c1_65, %c0_66, %c0_67], %173 {strides = array<i32>} : memref<2x64x128xf32, #tpu.memory_space<vmem>>, vector<1x64x128xf32>,
    return
  }
  func.func @transform_0(%arg0: i32) -> (i32, i32, i32) {
    %c0_i32 = arith.constant 0 : i32
    %c0_i32_0 = arith.constant 0 : i32
    %c0_i32_1 = arith.constant 0 : i32
    return %arg0, %c0_i32, %c0_i32_0 : i32, i32, i32
  }
  func.func @transform_1(%arg0: i32) -> (i32, i32, i32) {
    %c0_i32 = arith.constant 0 : i32
    %c0_i32_0 = arith.constant 0 : i32
    %c0_i32_1 = arith.constant 0 : i32
    %c0_i32_2 = arith.constant 0 : i32
    return %c0_i32, %c0_i32_0, %c0_i32_1 : i32, i32, i32
  }
  func.func @transform_2(%arg0: i32) -> (i32, i32, i32) {
    %c0_i32 = arith.constant 0 : i32
    %c0_i32_0 = arith.constant 0 : i32
    %c0_i32_1 = arith.constant 0 : i32
    %c0_i32_2 = arith.constant 0 : i32
    return %c0_i32, %c0_i32_0, %c0_i32_1 : i32, i32, i32
  }
  func.func @transform_3(%arg0: i32) -> (i32, i32) {
    %c0_i32 = arith.constant 0 : i32
    %c0_i32_0 = arith.constant 0 : i32
    %c0_i32_1 = arith.constant 0 : i32
    return %c0_i32, %c0_i32_0 : i32, i32
  }
  func.func @transform_4(%arg0: i32) -> (i32, i32) {
    %c0_i32 = arith.constant 0 : i32
    %c0_i32_0 = arith.constant 0 : i32
    %c0_i32_1 = arith.constant 0 : i32
    return %c0_i32, %c0_i32_0 : i32, i32
  }
  func.func @transform_5(%arg0: i32) -> (i32, i32, i32) {
    %c0_i32 = arith.constant 0 : i32
    %c0_i32_0 = arith.constant 0 : i32
    %c0_i32_1 = arith.constant 0 : i32
    return %arg0, %c0_i32, %c0_i32_0 : i32, i32, i32
  }
}

</mosaic_0001>

<bundles_post_ra>
// kernel: tpu_custom_call.1
= control target key start
LH: loop header
LB: loop body
LE: loop exit
PB: predicated region body
PF: predicated region fallthrough
CT: control target
= control target key end

     0   :  { %10 = vsyncpa [#allocation3], 0  ;;  %s1812_s0 = inlined_call_operand.vmem [shape: f32[2,32,128], index: 0, kind: input, shape index: {}]   ;;  %s1813_s1 = inlined_call_operand.vmem [shape: f32[3,8,24], index: 1, kind: input, shape index: {}]   ;;  %s1814_s2 = inlined_call_operand.vmem [shape: f32[3,8,1], index: 2, kind: input, shape index: {}]   ;;  %s1815_s3 = inlined_call_operand.hbm [shape: f32[64,96], index: 3, kind: input, shape index: {}]   ;;  %s1816_s4 = inlined_call_operand.vmem [shape: f32[64,1], index: 4, kind: input, shape index: {}]   ;;  %s1817_s5 = inlined_call_operand.hbm [shape: f32[2,64,128], index: 5, kind: output, shape index: {}]  }
   0x1   :  { %11 = vsyncpa [#allocation4], 0  ;;  %s1453_s18 = smov [#allocation2]   ;;  %s1405_s22 = scalar_lea.hbm %s1815_s3, 1024 }
   0x2   :  { %s23_s19 = sshll.u32 %s1453_s18, 4  ;;  %p1406_p0 = scmp.ne.s32.totalorder %s1815_s3, %s1405_s22  ;;  %s24_s19 = int_to_ptr.vmem [resolvable:$true] %s23_s19 }
   0x3   :  { %p1409_p1 = scmp.lt.u32.totalorder %s1405_s22, %s1815_s3 }
   0x5   :  { %p1411_p2 = pnand %p1409_p1, %p1406_p0 }
   0x7   :  { %1414 = shalt.err (!%p1411_p2)
}
   0x8   :  { %s1415_s27 = scalar_lea.vmem %s24_s19, 1024  ;;  %p1420_p4 = scmp.lt.s32.totalorder %s24_s19, %s24_s19 }
   0x9   :  { %p1416_p3 = scmp.ne.s32.totalorder %s24_s19, %s1415_s27  ;;  %p1421_p5 = scmp.lt.s32.totalorder %s1415_s27, %s1415_s27 }
   0xb   :  { %p1422_p6 = por %p1421_p5, %p1420_p4 }
   0xd   :  { %p1423_p7 = pnand %p1422_p6, %p1416_p3 }
   0xf   :  { %1426 = shalt.err (!%p1423_p7)
}
  0x10   :  { %s1454_s28 = smov 128   ;;  %s1455_s29 = smov 8  }
  0x11   :  { %29 = dma.hbm_to_vmem [thread:$0]  %s1815_s3, 1024, %s24_s19, [#allocation3], %s1454_s28, %s1454_s28, %s1455_s29  }
  0x12   :  { %1449 = dma.done.wait [#allocation3], 1024  }
  0x13   :  { %1450 = vsyncadd [#allocation3], 4294966272  ;;  %v1456_v0 = vmov 0.0|0.0   ;;  %vm1457_vm0 = vmmov 0   ;;  %v1458_v1 = vmov 0.0   ;;  %v1459_v2 = vmov 0  }
  0x14   :  { %1252 = vmatprep.subr.bf16.mxu0 %v1456_v0  ;;  %1256 = vmatprep.subr.bf16.mxu1 %v1456_v0  ;;  %v62_v3 = vld [vmem:[%s1812_s0 + $0x8] sm:$0xff]  ;;  %s1460_s8 = smov 1   ;;  %v42_v4 = vld [vmem:[%s1814_s2] sm:$0xff]  ;;  %s1461_s11 = smov 127   ;;  %v35_v5 = vlaneseq  ;;  %vm1462_vm2 = vmmov 1   ;;  %vm76_vm5 = vcmask 195584  }
  0x15   :  { %1132 = vmatprep.mubr.msk.f32.mxu0 %vm1457_vm0, %v1458_v1  ;;  %1141 = vmatprep.mubr.msk.f32.mxu1 %vm1457_vm0, %v1458_v1  ;;  %v39_v11 = vld [vmem:[%s1813_s1] sm:$0xff]  ;;  %v63_v17 = vld [vmem:[%s1812_s0 + $0x10] sm:$0xff]  ;;  %v43_v22 = vld [vmem:[%s1814_s2 + $0x8] sm:$0xff]  ;;  %vm393_vm12 = vcmask 785408  }
  0x16   :  { %1363 = vset.pattern.permute.xlu1 %v1459_v2  ;;  %1364 = vset.pattern.permute.xlu0 %v1459_v2  ;;  %v1523_v6 = vand.u32 127, %v35_v5  ;;  %v1551_v18 = vld [vmem:[%s1812_s0] sm:$0xff]  ;;  %v40_v25 = vld [vmem:[%s1813_s1 + $0x8] sm:$0xff]  ;;  %v64_v32 = vld [vmem:[%s1812_s0 + $0x18] sm:$0xff] }
  0x17   :  { %65 = vrot.lane.b32.xlu0 %v62_v3, %s1460_s8  ;;  %73 = vperm.xlu1 %1363, %v42_v4   ;;  %v1018_v35 = vld [vmem:[%s1812_s0 + $0x28] sm:$0xff]  ;;  %v1593_v40 = vld [vmem:[%s1813_s1 + $0x10] sm:$0xff]  ;;  %v1017_v50 = vld [vmem:[%s1812_s0 + $0x20] sm:$0xff] }
  0x18   :  { %vm1060_vm1 = vcmp.ne.s32.totalorder %v1523_v6, 0  ;;  %vm1061_vm4 = vcmp.ne.s32.totalorder %v1523_v6, 127  ;;  %v1019_v49 = vld [vmem:[%s1812_s0 + $0x30] sm:$0xff]  ;;  %v1020_v61 = vld [vmem:[%s1812_s0 + $0x38] sm:$0xff]  ;;  %v53_v4 = vld [vmem:[%s1816_s4] sm:$0xff] }
  0x19   :  { %vm1528_vm3 = vmpackc.low %vm1462_vm2, %vm1060_vm1  ;;  %v55_v5 = vld [vmem:[%s1816_s4 + $0x10] sm:$0xff]  ;;  %v1711_v6 = vld [vmem:[#allocation2 + $0x8] sm:$0xff] }
  0x1a   :  { %vm1667_vm10 = vmpackc.low %vm1060_vm1, %vm1060_vm1 }
  0x1b   :  { %68 = vrot.lane.b32.xlu0 %v62_v3, %s1461_s11  ;;  %vm1699_vm13 = vmpackc.low %vm1061_vm4, %vm1061_vm4 }
  0x89   :  { %v66_v7 = vpop.permute.xlu0 %65 }
  0x8a   :  { %v1253_v9 = vpack.c.bf16 %v62_v3, %v66_v7  ;;  %v57_v7 = vld [vmem:[%s1816_s4 + $0x20] sm:$0xff] }
  0x8c   :  { %1255 = vmatpush3.bf16.msk.msra.mxu0 %vm1528_vm3, %v1253_v9  ;;  %v59_v9 = vld [vmem:[%s1816_s4 + $0x30] sm:$0xff] }
  0x8d   :  { %1130 = vmatprep.subr.mxu0 %v1458_v1  ;;  %v69_v10 = vpop.permute.xlu0 %68 }
  0x90   :  { %1131 = vmatpush3.msk.msra.mxu0 %vm1061_vm4, %v69_v10 }
  0x91   :  { %1133 = vmatmul.mubr.msk.f32.vlgmr.msra.gmra.mrb[0].mxu0 %vm76_vm5, %v39_v11  ;;  %1260 = vmatprep.subr.bf16.mxu0 %v1456_v0 }
  0x92   :  { %1150 = vmatprep.mubr.msk.f32.mxu0 %vm1457_vm0, %v1458_v1 }
  0x96   :  { %v74_v12 = vpop.permute.xlu1 %73 }
 0x164   :  { %v146_v13 = vpop.f32.mrb[0].mxu0 }
 0x165   :  { %v147_v14 = vadd.f32 %v146_v13, %v74_v12  ;;  %v1134_v15 = vpop.f32.mrb[1].mxu0 }
 0x167   :  { %vm150_vm6 = vcmp.gt.f32.partialorder %v147_v14, 0.0  ;;  %v151_v16 = vmul.f32 0.1, %v147_v14 }
 0x169   :  { %v1553_v19 = vsel %vm150_vm6, %v147_v14, %v151_v16 }
 0x16a   :  { %v153_v20 = vadd.f32 %v1553_v19, %v63_v17  ;;  %v1558_v21 = vpack.c.bf16 %v1553_v19, %v1551_v18  ;;  %v1365_v2 = vpack.i.bf16 %v1553_v19, %v1551_v18 }
 0x16c   :  { %157 = vrot.lane.b32.xlu0 %v153_v20, %s1461_s11  ;;  %154 = vrot.lane.b32.xlu1 %v153_v20, %s1460_s8 }
 0x170   :  { %162 = vperm.xlu1 %1363, %v43_v22  }
 0x1de   :  { %v155_v23 = vpop.permute.xlu1 %154  ;;  %v158_v26 = vpop.permute.xlu0 %157 }
 0x1df   :  { %v1257_v24 = vpack.c.bf16 %v153_v20, %v155_v23 }
 0x1e1   :  { %1259 = vmatpush3.bf16.msk.msra.mxu1 %vm1528_vm3, %v1257_v24 }
 0x1e2   :  { %1139 = vmatprep.subr.mxu1 %v1458_v1 }
 0x1e5   :  { %1140 = vmatpush3.msk.msra.mxu1 %vm1061_vm4, %v158_v26 }
 0x1e6   :  { %1142 = vmatmul.mubr.msk.f32.vlgmr.msra.gmra.mrb[0].mxu1 %vm76_vm5, %v40_v25 }
 0x1ef   :  { %v163_v27 = vpop.permute.xlu1 %162 }
 0x2b9   :  { %v234_v28 = vpop.f32.mrb[0].mxu1 }
 0x2ba   :  { %v235_v29 = vadd.f32 %v234_v28, %v163_v27  ;;  %v1143_v30 = vpop.f32.mrb[1].mxu1 }
 0x2bc   :  { %vm238_vm7 = vcmp.gt.f32.partialorder %v235_v29, 0.0  ;;  %v239_v31 = vmul.f32 0.1, %v235_v29 }
 0x2be   :  { %v1577_v33 = vsel %vm238_vm7, %v235_v29, %v239_v31 }
 0x2bf   :  { %v241_v34 = vadd.f32 %v1577_v33, %v64_v32 }
 0x2c1   :  { %245 = vrot.lane.b32.xlu1 %v241_v34, %s1461_s11  ;;  %242 = vrot.lane.b32.xlu0 %v241_v34, %s1460_s8 }
 0x2c5   :  { %560 = vrot.lane.b32.xlu0 %v1018_v35, %s1460_s8  ;;  %563 = vrot.lane.b32.xlu1 %v1018_v35, %s1461_s11 }
 0x333   :  { %v243_v36 = vpop.permute.xlu0 %242  ;;  %v246_v41 = vpop.permute.xlu1 %245 }
 0x334   :  { %v1261_v37 = vpack.c.bf16 %v241_v34, %v243_v36 }
 0x336   :  { %1263 = vmatpush3.bf16.msk.msra.mxu0 %vm1528_vm3, %v1261_v37 }
 0x337   :  { %1148 = vmatprep.subr.mxu0 %v1458_v1  ;;  %v561_v38 = vpop.permute.xlu0 %560  ;;  %v564_v42 = vpop.permute.xlu1 %563 }
 0x338   :  { %v1297_v39 = vpack.c.bf16 %v1018_v35, %v561_v38 }
 0x33a   :  { %1149 = vmatpush3.msk.msra.mxu0 %vm1061_vm4, %v246_v41 }
 0x33b   :  { %1151 = vmatmul.mubr.msk.f32.vlgmr.msra.gmra.mrb[2].mxu0 %vm76_vm5, %v1593_v40  ;;  %1296 = vmatprep.subr.bf16.mxu0 %v1456_v0 }
 0x33c   :  { %1299 = vmatpush3.bf16.msk.msra.mxu0 %vm1528_vm3, %v1297_v39  ;;  %1195 = vmatprep.mubr.msk.f32.mxu0 %vm1457_vm0, %v1458_v1 }
 0x33d   :  { %1193 = vmatprep.subr.mxu0 %v1458_v1 }
 0x340   :  { %1194 = vmatpush3.msk.msra.mxu0 %vm1061_vm4, %v564_v42  ;;  %v49_v42 = vld [vmem:[#allocation2 + $0x20] sm:$0xff] }
 0x341   :  { %1196 = vmatmul.mubr.msk.f32.vlgmr.msra.gmra.mrb[4].mxu0 %vm76_vm5, %v39_v11  ;;  %1300 = vmatprep.subr.bf16.mxu0 %v1456_v0 }
 0x342   :  { %1204 = vmatprep.mubr.msk.f32.mxu0 %vm1457_vm0, %v1458_v1 }
 0x40e   :  { %v1611_v43 = vpop.f32.mrb[2].mxu0 }
 0x40f   :  { %v1152_v44 = vpop.f32.mrb[3].mxu0 }
 0x410   :  { %v51_v44 = vld [vmem:[#allocation2 + $0x30] sm:$0xff] }
 0x414   :  { %v632_v45 = vpop.f32.mrb[4].mxu0 }
 0x415   :  { %v633_v46 = vadd.f32 %v632_v45, %v74_v12  ;;  %v1197_v47 = vpop.f32.mrb[5].mxu0  ;;  %v52_v45 = vld [vmem:[#allocation2 + $0x38] sm:$0xff] }
 0x417   :  { %vm636_vm8 = vcmp.gt.f32.partialorder %v633_v46, 0.0  ;;  %v637_v48 = vmul.f32 0.1, %v633_v46 }
 0x419   :  { %v638_v51 = vsel %vm636_vm8, %v633_v46, %v637_v48 }
 0x41a   :  { %v639_v52 = vadd.f32 %v1019_v49, %v638_v51  ;;  %v1619_v53 = vpack.c.bf16 %v638_v51, %v1017_v50  ;;  %v1385_v3 = vpack.i.bf16 %v638_v51, %v1017_v50 }
 0x41c   :  { %643 = vrot.lane.b32.xlu1 %v639_v52, %s1461_s11  ;;  %640 = vrot.lane.b32.xlu0 %v639_v52, %s1460_s8 }
 0x48e   :  { %v641_v54 = vpop.permute.xlu0 %640  ;;  %v644_v56 = vpop.permute.xlu1 %643 }
 0x48f   :  { %v1301_v55 = vpack.c.bf16 %v639_v52, %v641_v54  ;;  %v54_v52 = vld [vmem:[%s1816_s4 + $0x8] sm:$0xff]  ;;  %v56_v54 = vld [vmem:[%s1816_s4 + $0x18] sm:$0xff] }
 0x491   :  { %1303 = vmatpush3.bf16.msk.msra.mxu0 %vm1528_vm3, %v1301_v55  ;;  %v58_v55 = vld [vmem:[%s1816_s4 + $0x28] sm:$0xff] }
 0x492   :  { %1202 = vmatprep.subr.mxu0 %v1458_v1 }
 0x495   :  { %1203 = vmatpush3.msk.msra.mxu0 %vm1061_vm4, %v644_v56  ;;  %v60_v56 = vld [vmem:[%s1816_s4 + $0x38] sm:$0xff]  ;;  %s1463_s4 = smov [#allocation5]  }
 0x496   :  { %1205 = vmatmul.mubr.msk.f32.vlgmr.msra.gmra.mrb[6].mxu0 %vm76_vm5, %v40_v25  ;;  %1304 = vmatprep.subr.bf16.mxu0 %v1456_v0  ;;  %v44_v0 = vld [vmem:[%s1814_s2 + $0x10] sm:$0xff] }
 0x497   :  { %1213 = vmatprep.mubr.msk.f32.mxu0 %vm1457_vm0, %v1458_v1 }
 0x569   :  { %v712_v57 = vpop.f32.mrb[6].mxu0 }
 0x56a   :  { %v713_v58 = vadd.f32 %v712_v57, %v163_v27  ;;  %v1206_v59 = vpop.f32.mrb[7].mxu0  ;;  %v45_v27 = vld [vmem:[#allocation2] sm:$0xff] }
 0x56b   :  { %1177 = vmatprep.mubr.msk.f32.mxu1 %vm393_vm12, %v45_v27 }
 0x56c   :  { %vm716_vm9 = vcmp.gt.f32.partialorder %v713_v58, 0.0  ;;  %v717_v60 = vmul.f32 0.1, %v713_v58 }
 0x56e   :  { %v1635_v62 = vsel %vm716_vm9, %v713_v58, %v717_v60 }
 0x56f   :  { %v719_v63 = vadd.f32 %v1020_v61, %v1635_v62 }
 0x571   :  { %723 = vrot.lane.b32.xlu1 %v719_v63, %s1461_s11  ;;  %720 = vrot.lane.b32.xlu0 %v719_v63, %s1460_s8 }
 0x575   :  { %1366 = vrot.lane.b32.xlu1 %v1365_v2, %s1460_s8  ;;  %250 = vperm.xlu0 %1364, %v44_v0  }
 0x579   :  { %1376 = vrot.lane.b32.xlu0 %v1365_v2, %s1461_s11 }
 0x57d   :  { %1386 = vrot.lane.b32.xlu0 %v1385_v3, %s1460_s8 }
 0x581   :  { %1396 = vrot.lane.b32.xlu0 %v1385_v3, %s1461_s11 }
 0x585   :  { %355 = vperm.xlu0 %1364, %v53_v4  }
 0x589   :  { %365 = vperm.xlu0 %1364, %v55_v5  }
 0x58d   :  { %375 = vperm.xlu0 %1364, %v57_v7  }
 0x591   :  { %385 = vperm.xlu0 %1364, %v59_v9  }
 0x5e3   :  { %v724_v10 = vpop.permute.xlu1 %723  ;;  %v721_v11 = vpop.permute.xlu0 %720 }
 0x5e4   :  { %v1305_v12 = vpack.c.bf16 %v719_v63, %v721_v11 }
 0x5e6   :  { %1307 = vmatpush3.bf16.msk.msra.mxu0 %vm1528_vm3, %v1305_v12 }
 0x5e7   :  { %v1367_v13 = vpop.permute.xlu1 %1366  ;;  %1211 = vmatprep.subr.mxu0 %v1458_v1 }
 0x5e8   :  { %v1369_v14 = vunpack.i.h.bf16 %v1367_v13  ;;  %v1368_v15 = vunpack.i.l.bf16 %v1367_v13 }
 0x5ea   :  { %v1264_v17 = vpack.c.bf16 %v1369_v14, %v1368_v15  ;;  %1212 = vmatpush3.msk.msra.mxu0 %vm1061_vm4, %v724_v10 }
 0x5eb   :  { %1214 = vmatmul.mubr.msk.f32.vlgmr.msra.gmra.mrb[8].mxu0 %vm76_vm5, %v1593_v40 }
 0x5ec   :  { %1266 = vmatprep.subr.msk.bf16.mxu1 %vm1667_vm10, %v1264_v17  ;;  %1240 = vmatprep.mubr.msk.f32.mxu0 %vm393_vm12, %v45_v27 }
 0x5ed   :  { %1269 = vmatpush3.bf16.msk.msra.mxu1 %vm1667_vm10, %v1264_v17 }
 0x5f4   :  { %v251_v1 = vpop.permute.xlu0 %250 }
 0x5f5   :  { %v323_v8 = vadd.f32 %v1611_v43, %v251_v1  ;;  %v50_v43 = vld [vmem:[#allocation2 + $0x28] sm:$0xff] }
 0x5f7   :  { %vm326_vm11 = vcmp.gt.f32.partialorder %v323_v8, 0.0  ;;  %v327_v18 = vmul.f32 0.1, %v323_v8 }
 0x5f8   :  { %v1377_v19 = vpop.permute.xlu0 %1376 }
 0x5f9   :  { %v328_v20 = vsel %vm326_vm11, %v323_v8, %v327_v18  ;;  %v1379_v32 = vunpack.i.h.bf16 %v1377_v19  ;;  %v1378_v34 = vunpack.i.l.bf16 %v1377_v19 }
 0x5fa   :  { %v1370_v22 = vpack.i.bf16 %v328_v20, %v1577_v33  ;;  %v1280_v35 = vpack.c.bf16 %v328_v20, %v1577_v33  ;;  %v1723_v33 = vld [vmem:[#allocation2 + $0x18] sm:$0xff] }
 0x5fb   :  { %v1284_v38 = vpack.c.bf16 %v1379_v32, %v1378_v34 }
 0x5fc   :  { %1371 = vrot.lane.b32.xlu1 %v1370_v22, %s1460_s8  ;;  %v1387_v23 = vpop.permute.xlu0 %1386 }
 0x5fd   :  { %v1389_v24 = vunpack.i.h.bf16 %v1387_v23  ;;  %v1388_v25 = vunpack.i.l.bf16 %v1387_v23 }
 0x5ff   :  { %v1308_v26 = vpack.c.bf16 %v1389_v24, %v1388_v25 }
 0x600   :  { %1381 = vrot.lane.b32.xlu1 %v1370_v22, %s1461_s11  ;;  %v1397_v61 = vpop.permute.xlu0 %1396 }
 0x601   :  { %1310 = vmatprep.subr.msk.bf16.mxu0 %vm1667_vm10, %v1308_v26  ;;  %v1399_v63 = vunpack.i.h.bf16 %v1397_v61  ;;  %v1398_v0 = vunpack.i.l.bf16 %v1397_v61 }
 0x602   :  { %1313 = vmatpush3.bf16.msk.msra.mxu0 %vm1667_vm10, %v1308_v26 }
 0x603   :  { %v1328_v4 = vpack.c.bf16 %v1399_v63, %v1398_v0 }
 0x66e   :  { %v1372_v28 = vpop.permute.xlu1 %1371 }
 0x66f   :  { %v1374_v29 = vunpack.i.h.bf16 %v1372_v28  ;;  %v1373_v30 = vunpack.i.l.bf16 %v1372_v28 }
 0x671   :  { %v1270_v31 = vpack.c.bf16 %v1374_v29, %v1373_v30 }
 0x672   :  { %v1382_v36 = vpop.permute.xlu1 %1381 }
 0x673   :  { %1272 = vmatprep.subr.msk.bf16.mxu1 %vm1667_vm10, %v1270_v31  ;;  %v1384_v39 = vunpack.i.h.bf16 %v1382_v36  ;;  %v1383_v40 = vunpack.i.l.bf16 %v1382_v36 }
 0x674   :  { %1275 = vmatpush3.bf16.msk.msra.mxu1 %vm1667_vm10, %v1270_v31 }
 0x675   :  { %1277 = vmatprep.subr.bf16.mxu1 %v1558_v21  ;;  %v1290_v41 = vpack.c.bf16 %v1384_v39, %v1383_v40 }
 0x678   :  { %1279 = vmatpush3.bf16.msra.mxu1 %v1558_v21  ;;  %v1715_v21 = vld [vmem:[#allocation2 + $0x10] sm:$0xff] }
 0x679   :  { %1281 = vmatprep.subr.bf16.mxu1 %v1280_v35 }
 0x67c   :  { %1283 = vmatpush3.bf16.msra.mxu1 %v1280_v35 }
 0x67d   :  { %1286 = vmatprep.subr.msk.bf16.mxu1 %vm1699_vm13, %v1284_v38 }
 0x680   :  { %1289 = vmatpush3.bf16.msk.msra.mxu1 %vm1699_vm13, %v1284_v38 }
 0x681   :  { %1292 = vmatprep.subr.msk.bf16.mxu1 %vm1699_vm13, %v1290_v41 }
 0x684   :  { %1295 = vmatpush3.bf16.msk.msra.mxu1 %vm1699_vm13, %v1290_v41 }
 0x685   :  { %1340 = vmatprep.subr.msk.bf16.mxu1 %vm1667_vm10, %v1308_v26 }
 0x687   :  { %1178 = vmatmul.mubr.msk.f32.vlgmr.msra.gmra.mrb[2].mxu1 %vm393_vm12, %v1711_v6 }
 0x688   :  { %1346 = vmatpush3.bf16.msk.msra.mxu1 %vm1667_vm10, %v1308_v26  ;;  %1180 = vmatprep.mubr.msk.f32.mxu1 %vm393_vm12, %v1715_v21 }
 0x68b   :  { %1181 = vmatmul.mubr.msk.f32.gmra.mrb[4].mxu1 %vm393_vm12, %v1723_v33 }
 0x68c   :  { %1183 = vmatprep.mubr.msk.f32.mxu1 %vm393_vm12, %v49_v42 }
 0x68f   :  { %1184 = vmatmul.mubr.msk.f32.gmra.mrb[6].mxu1 %vm393_vm12, %v50_v43 }
 0x690   :  { %1186 = vmatprep.mubr.msk.f32.mxu1 %vm393_vm12, %v51_v44 }
 0x693   :  { %1187 = vmatmul.mubr.msk.f32.gmra.mrb[8].mxu1 %vm393_vm12, %v52_v45 }
 0x694   :  { %1246 = vmatprep.mubr.msk.f32.mxu1 %vm393_vm12, %v49_v42 }
 0x6be   :  { %v792_v46 = vpop.f32.mrb[8].mxu0 }
 0x6bf   :  { %v793_v47 = vadd.f32 %v792_v46, %v251_v1  ;;  %v1215_v48 = vpop.f32.mrb[9].mxu0 }
 0x6c1   :  { %vm796_vm14 = vcmp.gt.f32.partialorder %v793_v47, 0.0  ;;  %v797_v49 = vmul.f32 0.1, %v793_v47 }
 0x6c3   :  { %v798_v50 = vsel %vm796_vm14, %v793_v47, %v797_v49 }
 0x6c4   :  { %v1390_v51 = vpack.i.bf16 %v798_v50, %v1635_v62  ;;  %v1324_v2 = vpack.c.bf16 %v798_v50, %v1635_v62  ;;  %v1782_v62 = vpop.permute.xlu0 %355 }
 0x6c6   :  { %1391 = vrot.lane.b32.xlu1 %v1390_v51, %s1460_s8  ;;  %s966_s8 = sshll.u32 %s1463_s4, 4  ;;  %s967_s8 = int_to_ptr.vmem [resolvable:$true] %s966_s8 }
 0x6c7   :  { %p1432_p9 = scmp.lt.s32.totalorder %s967_s8, %s967_s8 }
 0x6c8   :  { %v1789_v12 = vpop.permute.xlu0 %365 }
 0x6ca   :  { %1401 = vrot.lane.b32.xlu1 %v1390_v51, %s1461_s11  ;;  %s1427_s11 = scalar_lea.vmem %s967_s8, 2048 }
 0x6cb   :  { %p1428_p8 = scmp.ne.s32.totalorder %s967_s8, %s1427_s11  ;;  %p1433_p10 = scmp.lt.s32.totalorder %s1427_s11, %s1427_s11 }
 0x6cc   :  { %v376_v24 = vpop.permute.xlu0 %375 }
 0x6cd   :  { %p1434_p11 = por %p1433_p10, %p1432_p9 }
 0x6ce   :  { %360 = vperm.xlu1 %1363, %v54_v52  }
 0x6cf   :  { %p1435_p12 = pnand %p1434_p11, %p1428_p8 }
 0x6d0   :  { %v386_v38 = vpop.permute.xlu0 %385 }
 0x6d2   :  { %370 = vperm.xlu1 %1363, %v56_v54  }
 0x6d6   :  { %380 = vperm.xlu1 %1363, %v58_v55  }
 0x6da   :  { %390 = vperm.xlu1 %1363, %v60_v56  }
 0x738   :  { %v1392_v57 = vpop.permute.xlu1 %1391 }
 0x739   :  { %v1394_v58 = vunpack.i.h.bf16 %v1392_v57  ;;  %v1393_v59 = vunpack.i.l.bf16 %v1392_v57 }
 0x73b   :  { %v1314_v60 = vpack.c.bf16 %v1394_v58, %v1393_v59 }
 0x73c   :  { %v1402_v3 = vpop.permute.xlu1 %1401 }
 0x73d   :  { %1316 = vmatprep.subr.msk.bf16.mxu0 %vm1667_vm10, %v1314_v60  ;;  %1341 = vmatprep.subr.msk.bf16.mxu1 %vm1667_vm10, %v1314_v60  ;;  %v1404_v5 = vunpack.i.h.bf16 %v1402_v3  ;;  %v1403_v7 = vunpack.i.l.bf16 %v1402_v3 }
 0x73e   :  { %1319 = vmatpush3.bf16.msk.msra.mxu0 %vm1667_vm10, %v1314_v60  ;;  %1347 = vmatpush3.bf16.msk.msra.mxu1 %vm1667_vm10, %v1314_v60 }
 0x73f   :  { %1321 = vmatprep.subr.bf16.mxu0 %v1619_v53  ;;  %1342 = vmatprep.subr.bf16.mxu1 %v1619_v53  ;;  %v1334_v9 = vpack.c.bf16 %v1404_v5, %v1403_v7 }
 0x742   :  { %1323 = vmatpush3.bf16.msra.mxu0 %v1619_v53  ;;  %1348 = vmatpush3.bf16.msra.mxu1 %v1619_v53 }
 0x743   :  { %1325 = vmatprep.subr.bf16.mxu0 %v1324_v2  ;;  %1343 = vmatprep.subr.bf16.mxu1 %v1324_v2 }
 0x746   :  { %1327 = vmatpush3.bf16.msra.mxu0 %v1324_v2  ;;  %1349 = vmatpush3.bf16.msra.mxu1 %v1324_v2 }
 0x747   :  { %1330 = vmatprep.subr.msk.bf16.mxu0 %vm1699_vm13, %v1328_v4  ;;  %1344 = vmatprep.subr.msk.bf16.mxu1 %vm1699_vm13, %v1328_v4 }
 0x74a   :  { %1333 = vmatpush3.bf16.msk.msra.mxu0 %vm1699_vm13, %v1328_v4  ;;  %1350 = vmatpush3.bf16.msk.msra.mxu1 %vm1699_vm13, %v1328_v4 }
 0x74b   :  { %1336 = vmatprep.subr.msk.bf16.mxu0 %vm1699_vm13, %v1334_v9  ;;  %1345 = vmatprep.subr.msk.bf16.mxu1 %vm1699_vm13, %v1334_v9 }
 0x74d   :  { %v361_v53 = vpop.permute.xlu1 %360 }
 0x74e   :  { %1339 = vmatpush3.bf16.msk.msra.mxu0 %vm1699_vm13, %v1334_v9  ;;  %1351 = vmatpush3.bf16.msk.msra.mxu1 %vm1699_vm13, %v1334_v9 }
 0x751   :  { %1241 = vmatmul.mubr.msk.f32.vlgmr.msra.gmra.mrb[10].mxu0 %vm393_vm12, %v1711_v6  ;;  %1247 = vmatmul.mubr.msk.f32.vlgmr.msra.gmra.mrb[10].mxu1 %vm393_vm12, %v50_v43  ;;  %v1787_v10 = vpop.permute.xlu1 %370 }
 0x752   :  { %1243 = vmatprep.mubr.msk.f32.mxu0 %vm393_vm12, %v1715_v21  ;;  %1249 = vmatprep.mubr.msk.f32.mxu1 %vm393_vm12, %v51_v44 }
 0x755   :  { %1244 = vmatmul.mubr.msk.f32.gmra.mrb[12].mxu0 %vm393_vm12, %v1723_v33  ;;  %1250 = vmatmul.mubr.msk.f32.gmra.mrb[12].mxu1 %vm393_vm12, %v52_v45  ;;  %v381_v20 = vpop.permute.xlu1 %380 }
 0x759   :  { %v391_v35 = vpop.permute.xlu1 %390 }
 0x75a   :  { %v1179_v11 = vpop.f32.mrb[2].mxu1 }
 0x75b   :  { %v490_v13 = vadd.f32 %v1179_v11, %v361_v53  ;;  %v484_v14 = vpop.f32.mrb[3].mxu1 }
 0x75c   :  { %v485_v15 = vadd.f32 %v484_v14, %v1782_v62 }
 0x75d   :  { %vm524_vm15 = vcmp.gt.f32.partialorder %v490_v13, 0.0  ;;  %v532_v16 = vmul.f32 0.1, %v490_v13 }
 0x75e   :  { %vm523_vm0 = vcmp.gt.f32.partialorder %v485_v15, 0.0  ;;  %v531_v17 = vmul.f32 0.1, %v485_v15  ;;  %v1182_v1 = vpop.f32.mrb[4].mxu1 }
 0x75f   :  { %v540_v8 = vsel %vm524_vm15, %v490_v13, %v532_v16  ;;  %v500_v18 = vadd.f32 %v1182_v1, %v1787_v10  ;;  %v494_v19 = vpop.f32.mrb[5].mxu1 }
 0x760   :  { %548 = vst [vmem:[#allocation5 + $0x8] sm:$0xff] %v540_v8  ;;  %v539_v22 = vsel %vm523_vm0, %v485_v15, %v531_v17  ;;  %v495_v23 = vadd.f32 %v494_v19, %v1789_v12 }
 0x761   :  { %547 = vst [vmem:[#allocation5] sm:$0xff] %v539_v22  ;;  %vm526_vm1 = vcmp.gt.f32.partialorder %v500_v18, 0.0  ;;  %v534_v25 = vmul.f32 0.1, %v500_v18 }
 0x762   :  { %vm525_vm2 = vcmp.gt.f32.partialorder %v495_v23, 0.0  ;;  %v533_v26 = vmul.f32 0.1, %v495_v23  ;;  %v1185_v27 = vpop.f32.mrb[6].mxu1 }
 0x763   :  { %v542_v28 = vsel %vm526_vm1, %v500_v18, %v534_v25  ;;  %v510_v29 = vadd.f32 %v1185_v27, %v381_v20  ;;  %v504_v30 = vpop.f32.mrb[7].mxu1 }
 0x764   :  { %550 = vst [vmem:[#allocation5 + $0x18] sm:$0xff] %v542_v28  ;;  %v541_v31 = vsel %vm525_vm2, %v495_v23, %v533_v26  ;;  %v505_v32 = vadd.f32 %v504_v30, %v376_v24 }
 0x765   :  { %549 = vst [vmem:[#allocation5 + $0x10] sm:$0xff] %v541_v31  ;;  %vm528_vm3 = vcmp.gt.f32.partialorder %v510_v29, 0.0  ;;  %v536_v34 = vmul.f32 0.1, %v510_v29 }
 0x766   :  { %vm527_vm4 = vcmp.gt.f32.partialorder %v505_v32, 0.0  ;;  %v535_v36 = vmul.f32 0.1, %v505_v32  ;;  %v1188_v37 = vpop.f32.mrb[8].mxu1 }
 0x767   :  { %v544_v39 = vsel %vm528_vm3, %v510_v29, %v536_v34  ;;  %v520_v40 = vadd.f32 %v1188_v37, %v391_v35  ;;  %v514_v41 = vpop.f32.mrb[9].mxu1 }
 0x768   :  { %552 = vst [vmem:[#allocation5 + $0x28] sm:$0xff] %v544_v39  ;;  %v543_v6 = vsel %vm527_vm4, %v505_v32, %v535_v36  ;;  %v515_v21 = vadd.f32 %v514_v41, %v386_v38 }
 0x769   :  { %551 = vst [vmem:[#allocation5 + $0x20] sm:$0xff] %v543_v6  ;;  %vm530_vm5 = vcmp.gt.f32.partialorder %v520_v40, 0.0  ;;  %v538_v33 = vmul.f32 0.1, %v520_v40 }
 0x76a   :  { %vm529_vm6 = vcmp.gt.f32.partialorder %v515_v21, 0.0  ;;  %v537_v42 = vmul.f32 0.1, %v515_v21 }
 0x76b   :  { %v546_v43 = vsel %vm530_vm5, %v520_v40, %v538_v33 }
 0x76c   :  { %554 = vst [vmem:[#allocation5 + $0x38] sm:$0xff] %v546_v43  ;;  %v545_v44 = vsel %vm529_vm6, %v515_v21, %v537_v42 }
 0x76d   :  { %553 = vst [vmem:[#allocation5 + $0x30] sm:$0xff] %v545_v44 }
 0x824   :  { %v1242_v45 = vpop.f32.mrb[10].mxu0  ;;  %v1248_v46 = vpop.f32.mrb[10].mxu1 }
 0x825   :  { %v895_v47 = vadd.f32 %v1242_v45, %v361_v53  ;;  %v915_v48 = vadd.f32 %v1248_v46, %v381_v20  ;;  %v889_v49 = vpop.f32.mrb[11].mxu0  ;;  %v909_v50 = vpop.f32.mrb[11].mxu1 }
 0x826   :  { %v890_v51 = vadd.f32 %v889_v49, %v1782_v62  ;;  %v910_v52 = vadd.f32 %v909_v50, %v376_v24 }
 0x827   :  { %vm929_vm7 = vcmp.gt.f32.partialorder %v895_v47, 0.0  ;;  %v937_v54 = vmul.f32 0.1, %v895_v47  ;;  %vm933_vm8 = vcmp.gt.f32.partialorder %v915_v48, 0.0  ;;  %v941_v55 = vmul.f32 0.1, %v915_v48 }
 0x828   :  { %vm928_vm9 = vcmp.gt.f32.partialorder %v890_v51, 0.0  ;;  %v936_v56 = vmul.f32 0.1, %v890_v51  ;;  %vm932_vm10 = vcmp.gt.f32.partialorder %v910_v52, 0.0  ;;  %v940_v57 = vmul.f32 0.1, %v910_v52 }
 0x829   :  { %v945_v58 = vsel %vm929_vm7, %v895_v47, %v937_v54  ;;  %v949_v59 = vsel %vm933_vm8, %v915_v48, %v941_v55  ;;  %v1245_v60 = vpop.f32.mrb[12].mxu0  ;;  %v1251_v61 = vpop.f32.mrb[12].mxu1 }
 0x82a   :  { %954 = vst [vmem:[#allocation5 + $0x48] sm:$0xff] %v945_v58  ;;  %958 = vst [vmem:[#allocation5 + $0x68] sm:$0xff] %v949_v59  ;;  %v944_v63 = vsel %vm928_vm9, %v890_v51, %v936_v56  ;;  %v948_v0 = vsel %vm932_vm10, %v910_v52, %v940_v57  ;;  %v905_v2 = vadd.f32 %v1245_v60, %v1787_v10  ;;  %v899_v4 = vpop.f32.mrb[13].mxu0  ;;  %v919_v5 = vpop.f32.mrb[13].mxu1 }
 0x82b   :  { %v925_v3 = vadd.f32 %v1251_v61, %v391_v35  ;;  %953 = vst [vmem:[#allocation5 + $0x40] sm:$0xff] %v944_v63  ;;  %957 = vst [vmem:[#allocation5 + $0x60] sm:$0xff] %v948_v0  ;;  %v900_v7 = vadd.f32 %v899_v4, %v1789_v12  ;;  %v920_v9 = vadd.f32 %v919_v5, %v386_v38 }
 0x82c   :  { %vm931_vm11 = vcmp.gt.f32.partialorder %v905_v2, 0.0  ;;  %v939_v53 = vmul.f32 0.1, %v905_v2 }
 0x82d   :  { %vm935_vm12 = vcmp.gt.f32.partialorder %v925_v3, 0.0  ;;  %v943_v62 = vmul.f32 0.1, %v925_v3  ;;  %vm930_vm13 = vcmp.gt.f32.partialorder %v900_v7, 0.0  ;;  %v938_v11 = vmul.f32 0.1, %v900_v7 }
 0x82e   :  { %vm934_vm14 = vcmp.gt.f32.partialorder %v920_v9, 0.0  ;;  %v942_v13 = vmul.f32 0.1, %v920_v9  ;;  %v947_v14 = vsel %vm931_vm11, %v905_v2, %v939_v53 }
 0x82f   :  { %v951_v10 = vsel %vm935_vm12, %v925_v3, %v943_v62  ;;  %956 = vst [vmem:[#allocation5 + $0x58] sm:$0xff] %v947_v14  ;;  %v946_v15 = vsel %vm930_vm13, %v900_v7, %v938_v11 }
 0x830   :  { %960 = vst [vmem:[#allocation5 + $0x78] sm:$0xff] %v951_v10  ;;  %v950_v16 = vsel %vm934_vm14, %v920_v9, %v942_v13  ;;  %955 = vst [vmem:[#allocation5 + $0x50] sm:$0xff] %v946_v15 }
 0x831   :  { %959 = vst [vmem:[#allocation5 + $0x70] sm:$0xff] %v950_v16 }
 0x832   :  { %1438 = shalt.err (!%p1435_p12)
}
 0x833   :  { %s1439_s30 = scalar_lea.hbm %s1817_s5, 2048 }
 0x834   :  { %p1440_p13 = scmp.ne.s32.totalorder %s1817_s5, %s1439_s30  ;;  %p1443_p0 = scmp.lt.u32.totalorder %s1439_s30, %s1817_s5 }
 0x836   :  { %p1445_p1 = pnand %p1443_p0, %p1440_p13 }
 0x838   :  { %1448 = shalt.err (!%p1445_p1)
}
 0x839   :  { %972 = dma.vmem_to_hbm [thread:$0]  %s967_s8, 2048, %s1817_s5, [#allocation4], %s1454_s28, %s1454_s28, %s1455_s29  }
 0x83a   :  { %1451 = dma.done.wait [#allocation4], 2048  }
 0x83b   :  { %1452 = vsyncadd [#allocation4], 4294965248 }
 0x83c   :  { %976 = vsyncpa [#allocation3], 1 }
 0x83d   :  { %977 = vsyncpa [#allocation4], 1 }

</bundles_post_ra>
